<compile_context>
chip_gen: v7x
topology: tpu7x:2x2x1
jax: 0.10.0
libtpu: 0.0.40
codegen_flags: <defaults>
</compile_context>

<pallas_src>
import jax
import jax.numpy as jnp
from jax.experimental import pallas as pl
from jax.experimental.pallas import tpu as pltpu


def _linear_kernel(w_ref, b_ref, x_ref, o_ref):
    """w_ref, b_ref: SMEM (out_f,) f32 scalars.
    x_ref: VMEM (1, tb) f32 (batch on lanes). o_ref: VMEM (out_f, tb) f32."""
    x = x_ref[...]                       # (1, tb), lane-dense
    out_f = o_ref.shape[0]
    for j in range(out_f):               # out_f == 2 -> static unroll, pure VPU FMA
        o_ref[j:j + 1, :] = (x * w_ref[j] + b_ref[j]).astype(o_ref.dtype)


def _pick_batch_tile(batch: int) -> int:
    # Lane-dense tiles (multiples of 128) when the batch allows it; otherwise the
    # whole batch goes in a single block (legal: block dim == full array dim).
    for t in (2048, 1024, 512, 256, 128):
        if batch % t == 0:
            return t
    return batch


@jax.jit
def linear_net_forward(x, w_flat, b_flat):
    """x: (B, 1) f32; w_flat: (out_f,) f32 (== weight[:, 0]); b_flat: (out_f,) f32.
    Returns (B, out_f) f32, identical to PyTorch y = x @ W.T + b."""
    B = x.shape[0]
    out_f = w_flat.shape[0]
    tb = _pick_batch_tile(B)
    x_lane = x.reshape(1, B)             # in_features == 1 -> pure relabel, fused by jit

    y_t = pl.pallas_call(
        _linear_kernel,
        out_shape=jax.ShapeDtypeStruct((out_f, B), x.dtype),
        grid=(B // tb,),
        in_specs=[
            pl.BlockSpec(memory_space=pltpu.MemorySpace.SMEM),   # weight scalars
            pl.BlockSpec(memory_space=pltpu.MemorySpace.SMEM),   # bias scalars
            pl.BlockSpec((1, tb), lambda i: (0, i)),             # x tile (lane-dense)
        ],
        out_specs=pl.BlockSpec((out_f, tb), lambda i: (0, i)),   # y tile (lane-dense)
        compiler_params=pltpu.CompilerParams(
            dimension_semantics=("parallel",),                   # megacore sharding (v7x)
        ),
    )(w_flat, b_flat, x_lane)

    return y_t.T                          # (B, out_f); transpose fused by jit


def prepare_params(weight, bias):
    """One-time parameter prep (hoisted out of the per-call path).
    weight: (out_f, in_f=1) PyTorch layout; bias: (out_f,)."""
    out_f = weight.shape[0]
    return weight.reshape(out_f), bias.reshape(out_f)


if __name__ == "__main__":
    key = jax.random.PRNGKey(0)
    kx, kw, kb = jax.random.split(key, 3)

    B, in_f, out_f = 8, 1, 2
    # Mimic PyTorch default Linear init: U(-1/sqrt(in_f), 1/sqrt(in_f)) = U(-1, 1)
    weight = jax.random.uniform(kw, (out_f, in_f), jnp.float32, minval=-1.0, maxval=1.0)
    bias = jax.random.uniform(kb, (out_f,), jnp.float32, minval=-1.0, maxval=1.0)
    x = jax.random.normal(kx, (B, in_f), jnp.float32)

    w_flat, b_flat = prepare_params(weight, bias)   # done once, not per call

    y = linear_net_forward(x, w_flat, b_flat)
    jax.block_until_ready(y)

    # reference check against plain JAX (== PyTorch semantics)
    y_ref = x @ weight.T + bias
    assert y.shape == (B, out_f)
    assert jnp.allclose(y, y_ref, atol=1e-5, rtol=1e-5)
    print("KERNEL_OK")
</pallas_src>

<mosaic_0001>
module attributes {stable_mosaic.version = 11 : i64} {
  func.func @_linear_kernel(%arg0: i32, %arg1: memref<2xf32, #tpu.memory_space<smem>>, %arg2: memref<2xf32, #tpu.memory_space<smem>>, %arg3: memref<1x8xf32, #tpu.memory_space<vmem>>, %arg4: memref<2x8xf32, #tpu.memory_space<vmem>>) attributes {dimension_semantics = [#tpu.dimension_semantics<parallel>], iteration_bounds = array<i64: 1>, scalar_prefetch = 0 : i64, scratch_operands = 0 : i64, tpu.core_type = #tpu.core_type<tc>, window_params = [{transform_indices = @transform_0, window_bounds = array<i64: 2>}, {transform_indices = @transform_1, window_bounds = array<i64: 2>}, {transform_indices = @transform_2, window_bounds = array<i64: 1, 8>}, {transform_indices = @transform_3, window_bounds = array<i64: 2, 8>}]} {
    %c0 = arith.constant 0 : index
    %c0_0 = arith.constant 0 : index
    %0 = vector.load %arg3[%c0, %c0_0] : memref<1x8xf32, #tpu.memory_space<vmem>>, vector<1x8xf32>
    %c0_1 = arith.constant 0 : index
    %1 = memref.load %arg1[%c0_1] : memref<2xf32, #tpu.memory_space<smem>>
    %2 = vector.broadcast %1 : f32 to vector<1x8xf32>
    %3 = arith.mulf %0, %2 : vector<1x8xf32>
    %c0_2 = arith.constant 0 : index
    %4 = memref.load %arg2[%c0_2] : memref<2xf32, #tpu.memory_space<smem>>
    %5 = vector.broadcast %4 : f32 to vector<1x8xf32>
    %6 = arith.addf %3, %5 : vector<1x8xf32>
    %c0_3 = arith.constant 0 : index
    %c0_4 = arith.constant 0 : index
    %7 = vector.load %arg4[%c0_3, %c0_4] : memref<2x8xf32, #tpu.memory_space<vmem>>, vector<1x8xf32>
    tpu.vector_store %arg4[%c0_3, %c0_4], %6 {strides = array<i32>} : memref<2x8xf32, #tpu.memory_space<vmem>>, vector<1x8xf32>,
    %c1 = arith.constant 1 : index
    %8 = memref.load %arg1[%c1] : memref<2xf32, #tpu.memory_space<smem>>
    %9 = vector.broadcast %8 : f32 to vector<1x8xf32>
    %10 = arith.mulf %0, %9 : vector<1x8xf32>
    %c1_5 = arith.constant 1 : index
    %11 = memref.load %arg2[%c1_5] : memref<2xf32, #tpu.memory_space<smem>>
    %12 = vector.broadcast %11 : f32 to vector<1x8xf32>
    %13 = arith.addf %10, %12 : vector<1x8xf32>
    %c1_6 = arith.constant 1 : index
    %c0_7 = arith.constant 0 : index
    %14 = vector.load %arg4[%c1_6, %c0_7] : memref<2x8xf32, #tpu.memory_space<vmem>>, vector<1x8xf32>
    tpu.vector_store %arg4[%c1_6, %c0_7], %13 {strides = array<i32>} : memref<2x8xf32, #tpu.memory_space<vmem>>, vector<1x8xf32>,
    return
  }
  func.func @transform_0(%arg0: i32) -> i32 {
    %c0_i32 = arith.constant 0 : i32
    %c0_i32_0 = arith.constant 0 : i32
    return %c0_i32 : i32
  }
  func.func @transform_1(%arg0: i32) -> i32 {
    %c0_i32 = arith.constant 0 : i32
    %c0_i32_0 = arith.constant 0 : i32
    return %c0_i32 : i32
  }
  func.func @transform_2(%arg0: i32) -> (i32, i32) {
    %c0_i32 = arith.constant 0 : i32
    %c0_i32_0 = arith.constant 0 : i32
    return %c0_i32, %arg0 : i32, i32
  }
  func.func @transform_3(%arg0: i32) -> (i32, i32) {
    %c0_i32 = arith.constant 0 : i32
    %c0_i32_0 = arith.constant 0 : i32
    return %c0_i32, %arg0 : i32, i32
  }
}

</mosaic_0001>

<bundles_post_ra>
// kernel: linear_net_forward.1
= control target key start
LH: loop header
LB: loop body
LE: loop exit
PB: predicated region body
PF: predicated region fallthrough
CT: control target
= control target key end

     0   :  { %8 = vsyncpa [#allocation4], 0  ;;  %s173_s0 = inlined_call_operand.vmem [shape: f32[2], index: 0, kind: input, shape index: {}]   ;;  %s174_s1 = inlined_call_operand.vmem [shape: f32[2], index: 1, kind: input, shape index: {}]   ;;  %s175_s2 = inlined_call_operand.vmem [shape: f32[1,8], index: 2, kind: input, shape index: {}]   ;;  %s176_s3 = inlined_call_operand.hbm [shape: f32[2,8], index: 3, kind: output, shape index: {}]  }
   0x1   :  { %9 = vsyncpa [#allocation6], 0 }
   0x2   :  { %10 = vsyncpa [#allocation3], 0  ;;  %s17_s14 = sshll.u32 %s173_s0, 4  ;;  %s27_s17 = sshll.u32 %s174_s1, 4  ;;  %s18_s14 = int_to_ptr.vmem [resolvable:$true] %s17_s14  ;;  %s28_s17 = int_to_ptr.vmem [resolvable:$true] %s27_s17 }
   0x3   :  { %s77_s18 = scalar_lea.vmem %s18_s14, 16  ;;  %p82_p1 = scmp.lt.s32.totalorder %s18_s14, %s18_s14 }
   0x4   :  { %p78_p0 = scmp.ne.s32.totalorder %s18_s14, %s77_s18  ;;  %p83_p2 = scmp.lt.s32.totalorder %s77_s18, %s77_s18 }
   0x6   :  { %p84_p3 = por %p83_p2, %p82_p1 }
   0x8   :  { %p85_p4 = pnand %p84_p3, %p78_p0 }
   0xa   :  { %88 = shalt.err (!%p85_p4)
}
   0xb   :  { %s129_s19 = smov [#allocation2]   ;;  %s89_s20 = scalar_lea.vmem %s28_s17, 16 }
   0xc   :  { %20 = dma.vmem_to_smem %s18_s14, 16, %s129_s19, [#allocation4]  }
   0xd   :  { %p90_p5 = scmp.ne.s32.totalorder %s28_s17, %s89_s20  ;;  %p94_p6 = scmp.lt.s32.totalorder %s28_s17, %s28_s17 }
   0xe   :  { %p95_p7 = scmp.lt.s32.totalorder %s89_s20, %s89_s20 }
  0x10   :  { %p96_p8 = por %p95_p7, %p94_p6 }
  0x12   :  { %p97_p9 = pnand %p96_p8, %p90_p5 }
  0x14   :  { %100 = shalt.err (!%p97_p9)
}
  0x15   :  { %s130_s0 = smov [#allocation5]  }
  0x16   :  { %30 = dma.vmem_to_smem %s28_s17, 16, %s130_s0, [#allocation6]  }
  0x17   :  { %123 = dma.done.wait [#allocation4], 16  }
  0x18   :  { %124 = vsyncadd [#allocation4], 4294967280 }
  0x19   :  { %125 = dma.done.wait [#allocation6], 16  }
  0x1a   :  { %126 = vsyncadd [#allocation6], 4294967280 }
  0x1b   :  { %39 = sfence }
  0x1c   :  { %s41_s1 = sld [smem:[#allocation2]]  ;;  %s72_s22 = sld [smem:[#allocation2 + $0x1]]  ;;  %v40_v0 = vld [vmem:[%s175_s2] sm:$0x1]  ;;  %vm47_vm0 = vcmask 57344  }
  0x1d   :  { %s44_s21 = sld [smem:[#allocation5]]  ;;  %s73_s23 = sld [smem:[#allocation5 + $0x1]] }
  0x1e   :  { %s131_s26 = smov [#allocation7]  }
  0x1f   :  { %s62_s27 = sshll.u32 %s131_s26, 4  ;;  %s63_s27 = int_to_ptr.vmem [resolvable:$true] %s62_s27 }
  0x20   :  { %s101_s28 = scalar_lea.vmem %s63_s27, 32  ;;  %p106_p11 = scmp.lt.s32.totalorder %s63_s27, %s63_s27 }
  0x21   :  { %p102_p10 = scmp.ne.s32.totalorder %s63_s27, %s101_s28  ;;  %p107_p12 = scmp.lt.s32.totalorder %s101_s28, %s101_s28 }
  0x22   :  { %v42_v1 = vstv %s41_s1  ;;  %v50_v4 = vstv %s72_s22 }
  0x23   :  { %v45_v2 = vstv %s44_s21  ;;  %v43_v3 = vmul.f32 %v42_v1, %v40_v0  ;;  %v53_v5 = vstv %s73_s23  ;;  %v51_v6 = vmul.f32 %v50_v4, %v40_v0  ;;  %p108_p13 = por %p107_p12, %p106_p11 }
  0x25   :  { %v46_v7 = vadd.f32 %v45_v2, %v43_v3  ;;  %v54_v8 = vadd.f32 %v53_v5, %v51_v6  ;;  %p109_p0 = pnand %p108_p13, %p102_p10 }
  0x27   :  { %48 = vst.msk [vmem:[#allocation7] sm:$0x1] %vm47_vm0, %v46_v7  ;;  %55 = vst.msk [vmem:[#allocation7 + $0x1] sm:$0x1] %vm47_vm0, %v54_v8 }
  0x28   :  { %112 = shalt.err (!%p109_p0)
}
  0x29   :  { %s113_s30 = scalar_lea.hbm %s176_s3, 32 }
  0x2a   :  { %p114_p1 = scmp.ne.s32.totalorder %s176_s3, %s113_s30  ;;  %p117_p2 = scmp.lt.u32.totalorder %s113_s30, %s176_s3 }
  0x2c   :  { %p119_p3 = pnand %p117_p2, %p114_p1 }
  0x2e   :  { %122 = shalt.err (!%p119_p3)
}
  0x2f   :  { %65 = dma.vmem_to_hbm [thread:$0]  %s63_s27, 32, %s176_s3, [#allocation3]  }
  0x30   :  { %127 = dma.done.wait [#allocation3], 32  }
  0x31   :  { %128 = vsyncadd [#allocation3], 4294967264 }
  0x32   :  { %69 = vsyncpa [#allocation3], 1 }
  0x33   :  { %70 = vsyncpa [#allocation4], 1 }
  0x34   :  { %71 = vsyncpa [#allocation6], 1 }

</bundles_post_ra>
